<compile_context>
chip_gen: v7x
topology: tpu7x:2x2x1
jax: 0.10.0
libtpu: 0.0.40
codegen_flags: <defaults>
</compile_context>

<pallas_src>
import math

import jax
import jax.numpy as jnp
from jax import lax
from jax.experimental import pallas as pl
from jax.experimental.pallas import tpu as pltpu


_TM_MAX = 1024                  # sublane-aligned tile cap (multiple of 8)
_TN_MAX = 2048                  # lane-aligned tile cap (multiple of 128)
_VMEM_LIMIT_BYTES = 32 << 20    # explicit scoped-VMEM limit (safe v5e/v6e/v7x)
_VMEM_BUDGET_BYTES = 24 << 20   # double-buffered working-set budget (headroom)


def _round_up(x, m):
    return ((x + m - 1) // m) * m


def _padded_step_bytes(bt, tm, tn, R, u_item, v_item, out_item):
    """Double-buffered VMEM footprint of one grid step, (8,128)-padded."""
    r_lane = _round_up(R, 128)
    r_sub = _round_up(R, 8)
    tm_sub = _round_up(tm, 8)
    tn_lane = _round_up(tn, 128)
    u_b = bt * tm_sub * r_lane * u_item
    s_b = bt * 8 * r_lane * 4                     # s kept in f32
    vt_b = bt * r_sub * tn_lane * v_item
    out_b = bt * tm_sub * tn_lane * out_item
    return 2 * (u_b + s_b + vt_b + out_b)         # x2: double buffering


def _pick_tiles(B, M, N, R, u_item, v_item, out_item):
    """Pick (bt, tm, tn) respecting (8,128), padded-VMEM budget, megacore."""
    # Balanced ragged tiling: split M/N into near-equal chunks instead of a
    # hard cap so remainder tiles are never nearly empty.
    if M <= _TM_MAX:
        tm = M
    else:
        tm = _round_up(pl.cdiv(M, pl.cdiv(M, _TM_MAX)), 8)
    if N <= _TN_MAX:
        tn = N
    else:
        tn = _round_up(pl.cdiv(N, pl.cdiv(N, _TN_MAX)), 128)

    # Safety valve: shrink tiles until a single (double-buffered) step fits.
    while (_padded_step_bytes(1, tm, tn, R, u_item, v_item, out_item)
           > _VMEM_BUDGET_BYTES) and (tm > 8 or tn > 128):
        if tm >= tn and tm > 8:
            tm = max(_round_up(tm // 2, 8), 8)
        elif tn > 128:
            tn = max(_round_up(tn // 2, 128), 128)
        else:
            break

    # Batch-pack small matrices (whole matrix per step): amortize per-step
    # overhead with bigger DMAs. Budget on *padded* bytes (incl. u/s/vt and
    # double buffers) and keep >= 2 batch grid steps so v7x's two TensorCores
    # both get work.
    bt = 1
    if tm == M and tn == N and B > 1:
        per_mat = _padded_step_bytes(1, tm, tn, R, u_item, v_item, out_item)
        max_bt = max(int(_VMEM_BUDGET_BYTES // max(per_mat, 1)), 1)
        max_bt = min(max_bt, max(B // 2, 1))       # leading grid axis >= 2
        if max_bt > 1:
            nb = pl.cdiv(B, max_bt)
            bt = pl.cdiv(B, nb)                    # balanced; no divisor rule
    return bt, tm, tn


def _reconstruct_kernel(u_ref, s_ref, vt_ref, o_ref):
    # u_ref : (bt, tm, R)   s_ref : (bt, 1, R) f32   vt_ref : (bt, R, tn)
    # o_ref : (bt, tm, tn)
    us = u_ref[...].astype(jnp.float32) * s_ref[...]      # VPU scale, f32
    o = lax.dot_general(
        us, vt_ref[...].astype(jnp.float32),
        dimension_numbers=(((2,), (1,)), ((0,), (0,))),    # contract R, batch bt
        preferred_element_type=jnp.float32,
    )
    o_ref[...] = o.astype(o_ref.dtype)


def svd_reconstruct(u, s, vt):
    """Pallas implementation of einsum('bir,br,brj->bij', u, s, vt)."""
    B, M, R = u.shape
    N = vt.shape[-1]
    out_dtype = u.dtype
    out_item = jnp.dtype(out_dtype).itemsize
    u_item = jnp.dtype(u.dtype).itemsize
    v_item = jnp.dtype(vt.dtype).itemsize

    s3 = s.reshape(B, 1, R).astype(jnp.float32)    # keep singular values in f32

    bt, tm, tn = _pick_tiles(B, M, N, R, u_item, v_item, out_item)
    grid = (pl.cdiv(B, bt), pl.cdiv(M, tm), pl.cdiv(N, tn))

    cost = pl.CostEstimate(
        flops=2 * B * M * N * R,
        transcendentals=0,
        bytes_accessed=(out_item * B * M * N + u_item * B * M * R
                        + v_item * B * N * R + 4 * B * R),
    )

    # TODO(synk): for N < 128 a lane-dense (B, M*N) output slab would avoid
    # masked vst.msk partial stores; needs a bundle-dump check of the in-kernel
    # relayout cost first, so the straightforward (B, M, N) layout is kept.
    return pl.pallas_call(
        _reconstruct_kernel,
        out_shape=jax.ShapeDtypeStruct((B, M, N), out_dtype),
        grid_spec=pltpu.PrefetchScalarGridSpec(
            num_scalar_prefetch=0,
            grid=grid,
            in_specs=[
                pl.BlockSpec((bt, tm, R), lambda b, i, j: (b, i, 0)),   # u
                pl.BlockSpec((bt, 1, R), lambda b, i, j: (b, 0, 0)),    # s (f32)
                pl.BlockSpec((bt, R, tn), lambda b, i, j: (b, 0, j)),   # v^T
            ],
            out_specs=pl.BlockSpec((bt, tm, tn), lambda b, i, j: (b, i, j)),
        ),
        compiler_params=pltpu.CompilerParams(
            dimension_semantics=("parallel", "parallel", "parallel"),
            vmem_limit_bytes=_VMEM_LIMIT_BYTES,
        ),
        cost_estimate=cost,
    )(u, s3, vt)


class SVDPallas:
    """JAX/Pallas port of factorizer SVD (forward = decompose + reconstruct)."""

    def __init__(self, size, rank=None, compression=10.0):
        M, N = size
        assert (rank, compression) != (None, None)
        df_input = M * N
        df_lowrank = M + N
        if rank is None:
            rank = max(math.ceil(df_input / (compression * df_lowrank)), 1)
        self.size = size
        self.rank = rank
        self.compression = df_input / (rank * df_lowrank)

    def decompose(self, x):
        # TODO(synk): torch.svd_lowrank (randomized SVD: QR + small dense SVD)
        # has no clean Pallas equivalent; deterministic truncated
        # jnp.linalg.svd is used instead.
        U, S, Vh = jnp.linalg.svd(x, full_matrices=False)
        R = self.rank
        u = U[..., :R]                # (B, M, R)
        s = S[..., :R]                # (B, R)
        vt = Vh[..., :R, :]           # (B, R, N): lane-dense, no transposes
        return u, s, vt

    def __call__(self, x):
        u, s, vt = self.decompose(x)
        return svd_reconstruct(u, s, vt)


if __name__ == "__main__":
    key = jax.random.PRNGKey(0)
    B, M, N = 2, 32, 64
    rank = 8

    x = jax.random.normal(key, (B, M, N), dtype=jnp.float32)

    mod = SVDPallas(size=(M, N), rank=rank)
    out = jax.block_until_ready(mod(x))

    # Reference check of the Pallas reconstruction against plain-JAX einsum.
    u, s, vt = mod.decompose(x)
    ref = jnp.einsum("bir,br,brj->bij", u, s, vt)
    assert out.shape == (B, M, N)
    assert out.dtype == x.dtype
    assert jnp.allclose(out, ref, atol=1e-4, rtol=1e-4)

    # Tiled path: M/N above the per-tile caps -> balanced ragged tiles on both
    # axes (tm=552, tn=1152 with remainders), grid=(2,2,2).
    k = jax.random.split(jax.random.PRNGKey(1), 3)
    B2, M2, N2, R2 = 2, 1100, 2200, 8
    u2 = jax.random.normal(k[0], (B2, M2, R2), dtype=jnp.float32)
    s2 = jax.random.uniform(k[1], (B2, R2), dtype=jnp.float32)
    vt2 = jax.random.normal(k[2], (B2, R2, N2), dtype=jnp.float32)
    out2 = jax.block_until_ready(svd_reconstruct(u2, s2, vt2))
    ref2 = jnp.einsum("bir,br,brj->bij", u2, s2, vt2)
    assert jnp.allclose(out2, ref2, atol=1e-3, rtol=1e-3)

    # Batch-packed small-matrix path (bt > 1, >= 2 batch grid steps), bf16
    # factors with f32 singular values.
    k = jax.random.split(jax.random.PRNGKey(2), 3)
    B3, M3, N3, R3 = 16, 32, 64, 8
    u3 = jax.random.normal(k[0], (B3, M3, R3), dtype=jnp.bfloat16)
    s3 = jax.random.uniform(k[1], (B3, R3), dtype=jnp.float32)
    vt3 = jax.random.normal(k[2], (B3, R3, N3), dtype=jnp.bfloat16)
    out3 = jax.block_until_ready(svd_reconstruct(u3, s3, vt3))
    ref3 = jnp.einsum("bir,br,brj->bij",
                      u3.astype(jnp.float32), s3, vt3.astype(jnp.float32))
    assert out3.dtype == jnp.bfloat16
    assert jnp.allclose(out3.astype(jnp.float32), ref3, atol=2e-2, rtol=2e-2)

    print("KERNEL_OK")
</pallas_src>

<mosaic_0001>
module attributes {stable_mosaic.version = 11 : i64} {
  func.func @_reconstruct_kernel(%arg0: i32, %arg1: i32, %arg2: i32, %arg3: memref<1x32x8xf32, #tpu.memory_space<vmem>>, %arg4: memref<1x1x8xf32, #tpu.memory_space<vmem>>, %arg5: memref<1x8x64xf32, #tpu.memory_space<vmem>>, %arg6: memref<1x32x64xf32, #tpu.memory_space<vmem>>) attributes {dimension_semantics = [#tpu.dimension_semantics<parallel>, #tpu.dimension_semantics<parallel>, #tpu.dimension_semantics<parallel>], iteration_bounds = array<i64: 2, 1, 1>, scalar_prefetch = 0 : i64, scratch_operands = 0 : i64, tpu.core_type = #tpu.core_type<tc>, window_params = [{transform_indices = @transform_0, window_bounds = array<i64: 1, 32, 8>}, {transform_indices = @transform_1, window_bounds = array<i64: 1, 1, 8>}, {transform_indices = @transform_2, window_bounds = array<i64: 1, 8, 64>}, {transform_indices = @transform_3, window_bounds = array<i64: 1, 32, 64>}]} {
    %c0 = arith.constant 0 : index
    %c0_0 = arith.constant 0 : index
    %c0_1 = arith.constant 0 : index
    %0 = vector.load %arg3[%c0, %c0_0, %c0_1] : memref<1x32x8xf32, #tpu.memory_space<vmem>>, vector<1x32x8xf32>
    %c0_2 = arith.constant 0 : index
    %c0_3 = arith.constant 0 : index
    %c0_4 = arith.constant 0 : index
    %1 = vector.load %arg4[%c0_2, %c0_3, %c0_4] : memref<1x1x8xf32, #tpu.memory_space<vmem>>, vector<1x1x8xf32>
    %2 = vector.broadcast %1 : vector<1x1x8xf32> to vector<1x32x8xf32>
    %3 = arith.mulf %0, %2 : vector<1x32x8xf32>
    %c0_5 = arith.constant 0 : index
    %c0_6 = arith.constant 0 : index
    %c0_7 = arith.constant 0 : index
    %4 = vector.load %arg5[%c0_5, %c0_6, %c0_7] : memref<1x8x64xf32, #tpu.memory_space<vmem>>, vector<1x8x64xf32>
    %cst = arith.constant dense<0.000000e+00> : vector<1x32x64xf32>
    %5 = tpu.matmul %3, %4, %cst {dimension_numbers = #tpu.dot_dimension_numbers<[2], [1], [1], [2], [0, 0, 0, 1, 1, 2], [0], [0]>} : vector<1x32x8xf32>, vector<1x8x64xf32>, vector<1x32x64xf32> -> vector<1x32x64xf32>
    %c0_8 = arith.constant 0 : index
    %c0_9 = arith.constant 0 : index
    %c0_10 = arith.constant 0 : index
    %6 = vector.load %arg6[%c0_8, %c0_9, %c0_10] : memref<1x32x64xf32, #tpu.memory_space<vmem>>, vector<1x32x64xf32>
    tpu.vector_store %arg6[%c0_8, %c0_9, %c0_10], %5 {strides = array<i32>} : memref<1x32x64xf32, #tpu.memory_space<vmem>>, vector<1x32x64xf32>,
    return
  }
  func.func @transform_0(%arg0: i32, %arg1: i32, %arg2: i32) -> (i32, i32, i32) {
    %c0_i32 = arith.constant 0 : i32
    %c0_i32_0 = arith.constant 0 : i32
    return %arg0, %arg1, %c0_i32 : i32, i32, i32
  }
  func.func @transform_1(%arg0: i32, %arg1: i32, %arg2: i32) -> (i32, i32, i32) {
    %c0_i32 = arith.constant 0 : i32
    %c0_i32_0 = arith.constant 0 : i32
    %c0_i32_1 = arith.constant 0 : i32
    return %arg0, %c0_i32, %c0_i32_0 : i32, i32, i32
  }
  func.func @transform_2(%arg0: i32, %arg1: i32, %arg2: i32) -> (i32, i32, i32) {
    %c0_i32 = arith.constant 0 : i32
    %c0_i32_0 = arith.constant 0 : i32
    return %arg0, %c0_i32, %arg2 : i32, i32, i32
  }
  func.func @transform_3(%arg0: i32, %arg1: i32, %arg2: i32) -> (i32, i32, i32) {
    %c0_i32 = arith.constant 0 : i32
    return %arg0, %arg1, %arg2 : i32, i32, i32
  }
}

</mosaic_0001>

<bundles_post_ra>
// kernel: tpu_custom_call.1
= control target key start
LH: loop header
LB: loop body
LE: loop exit
PB: predicated region body
PF: predicated region fallthrough
CT: control target
= control target key end

     0   :  { %8 = vsyncpa [#allocation3], 0  ;;  %s811_s0 = inlined_call_operand.vmem [shape: f32[2,32,8], index: 0, kind: input, shape index: {}]   ;;  %s812_s1 = inlined_call_operand.vmem [shape: f32[2,1,8], index: 1, kind: input, shape index: {}]   ;;  %s813_s2 = inlined_call_operand.vmem [shape: f32[2,8,64], index: 2, kind: input, shape index: {}]   ;;  %s814_s3 = inlined_call_operand.hbm [shape: f32[2,32,64], index: 3, kind: output, shape index: {}]  }
   0x1   :  { %10 = vsyncpa [#allocation3 + $0x1], 0  ;;  %s690_s12 = smov 0   ;;  %s692_s13 = smov 0  }
   0x2   :  { %s694_s14 = smov 0   ;;  %s696_s15 = smov 0  }
   0x3   :  { %s698_s16 = smov 0   ;;  %s700_s17 = smov 0  }
   0x4 LB: > { %s494_s18 = sadd.s32 4294967295, %s665_s17   ;;  %s495_s19 = sadd.s32 4294967294, %s665_s17   ;;  %s665_s17 = sphi %s700_s17, %s16_s17   ;;  %s661_s16 = sphi %s698_s16, %s821_s16   ;;  %s657_s15 = sphi %s696_s15, %s820_s15   ;;  %s653_s14 = sphi %s694_s14, %s819_s14   ;;  %s649_s13 = sphi %s692_s13, %s818_s13   ;;  %s645_s12 = sphi %s690_s12, %s817_s12  }
   0x5   : > { %s35_s20 = sadd.s32 1, %s661_s16  ;;  %s128_s21 = sadd.s32 1, %s653_s14 }
   0x6   : > { %p37_p0 = scmp.ge.s32.totalorder %s35_s20, 2  ;;  %p138_p1 = scmp.ne.s32.totalorder %s653_s14, %s649_s13 }
   0x7   : > { %p139_p2 = scmp.eq.s32.totalorder %s494_s18, 1  ;;  %p144_p3 = scmp.ne.s32.totalorder %s649_s13, %s645_s12 }
   0x8   : > { %s823_s20 = smov (%p37_p0, %s35_s20), 0  ;;  %p145_p5 = scmp.eq.s32.totalorder %s495_s19, 1 }
   0x9   : > { %p730_p4 = por %p139_p2, %p138_p1  ;;  %s121_s23 = ssub.s32 %s661_s16, %s823_s20 }
   0xa   : > { %p498_p6 = scmp.ge.s32.totalorder %s665_s17, 1  ;;  %p126_p7 = scmp.eq.s32.totalorder %s121_s23, 0 }
   0xb   : > { %p737_p8 = por %p145_p5, %p144_p3  ;;  %p192_p9 = scmp.lt.s32.totalorder %s665_s17, 3 }
   0xc   : > { %s743_s25 = scalar_select %p126_p7, %s653_s14, %s128_s21  }
   0xd   : > { %p193_p10 = pnand %p498_p6, %p192_p9 }
   0xe   : > { %p231_p11 = scmp.lt.s32.totalorder (!%p193_p10), %s657_s15, 1  ;;  %vm267_vm0 = vcmask (!%p193_p10), 64512   ;;  %s227_s11 = sand.u32 (!%p193_p10), 1, %s649_s13   ;;  %vm365_vm1 = vcmask (!%p193_p10), 523264  }
   0xf   : > { %196 = sbr.rel (%p193_p10) target bundleno = 260 (0x104), region = 32  ;;  %s499_s18 = sshll.u32 (!%p193_p10), %s227_s11, 5 }
  0x10   : > { %s229_s19 = scalar_lea.vmem (!%p193_p10), [#allocation2], %s499_s18  ;;  %s514_s23 = sshll.u32 (!%p193_p10), %s657_s15, 9 }
  0x11   : > { %s387_s21 = sshll.u32 (!%p193_p10), %s229_s19, 4  ;;  %s667_s30 = smov (!%p193_p10), [#allocation2]   ;;  %s758_s21 = int_to_ptr.vmem [resolvable:$true] %s387_s21 }
  0x12   : > { %s587_s29 = scalar_lea.vmem (!%p193_p10), %s758_s21, 512 }
  0x13   : > { %p588_p12 = scmp.ne.s32.totalorder (!%p193_p10), %s758_s21, %s587_s29 }
  0x15   : > { %p589_p13 = pnand (!%p193_p10), %p588_p12, %p730_p4 }
  0x16   : > { %s232_s26 = scalar_select %p231_p11, %s657_s15, 1 }
  0x17   : > { %s765_s15 = scalar_lea.sflag [#allocation3], %s227_s11  ;;  %p590_p0 = pneg %p589_p13 }
  0x18   : > { %s502_s27 = sshll.u32 %s232_s26, 3  ;;  %s513_s28 = sshll.u32 %s232_s26, 5 }
  0x19   : > { %s249_s4 = scalar_lea.vmem %s813_s2, %s502_s27  ;;  %s238_s7 = scalar_lea.vmem %s811_s0, %s513_s28 }
  0x1a   : > { %v266_v0 = vld [vmem:[%s249_s4] sm:$0xff]  ;;  %s242_s10 = scalar_lea.vmem %s812_s1, %s232_s26  ;;  %v253_v2 = vld [vmem:[%s238_s7 + $0x10] sm:$0xff]  ;;  %v252_v4 = vld [vmem:[%s238_s7 + $0x8] sm:$0xff]  ;;  %s763_s28 = scalar_lea.hbm %s814_s3, %s514_s23 }
  0x1b   : > { %v251_v1 = vld [vmem:[%s238_s7] sm:$0xff]  ;;  %520 = vmatprep.subr.mxu0 %v266_v0  ;;  %528 = vmatprep.subr.mxu1 %v266_v0  ;;  %v254_v5 = vld [vmem:[%s238_s7 + $0x18] sm:$0xff]  ;;  %s591_s4 = sshll.u32 %s667_s30, 4  ;;  %s592_s4 = int_to_ptr.vmem [resolvable:$false] %s591_s4 }
  0x1c   : > { %v503_v3 = vld [vmem:[%s242_s10] ss:$0 sm:$0xff]  ;;  %521 = vmatpush3.msra.mxu0 %v266_v0  ;;  %529 = vmatpush3.msra.mxu1 %v266_v0  ;;  %s593_s5 = scalar_lea.vmem %s592_s4, 1024  ;;  %p594_p1 = scmp.lt.s32.totalorder %s758_s21, %s592_s4 }
  0x1d   : > { %v262_v6 = vmul.f32 %v503_v3, %v251_v1  ;;  %v264_v7 = vmul.f32 %v503_v3, %v253_v2  ;;  %v263_v8 = vmul.f32 %v503_v3, %v252_v4  ;;  %v265_v9 = vmul.f32 %v503_v3, %v254_v5  ;;  %p595_p2 = scmp.lt.s32.totalorder %s593_s5, %s587_s29 }
  0x1f   : > { %522 = vmatprep.mubr.msk.f32.mxu0 %vm267_vm0, %v262_v6  ;;  %525 = vmatprep.mubr.msk.f32.mxu1 %vm267_vm0, %v264_v7  ;;  %p596_p3 = por %p595_p2, %p594_p1 }
  0x20   : > { %523 = vmatmul.mubr.msk.f32.vlgmr.msra.gmra.mrb[0].mxu0 %vm267_vm0, %v263_v8  ;;  %526 = vmatmul.mubr.msk.f32.vlgmr.msra.gmra.mrb[0].mxu1 %vm267_vm0, %v265_v9 }
  0x21   : > { %p597_p5 = pnand %p596_p3, %p590_p0 }
  0xf3   : > { %v524_v10 = vpop.f32.mrb[0].mxu0  ;;  %v527_v11 = vpop.f32.mrb[0].mxu1 }
  0xf4   : > { %367 = vst.msk [vmem:[%s229_s19 + $0x8] sm:$0xff] %vm365_vm1, %v524_v10  ;;  %369 = vst.msk [vmem:[%s229_s19 + $0x18] sm:$0xff] %vm365_vm1, %v527_v11  ;;  %v346_v12 = vpop.f32.mrb[1].mxu0  ;;  %v356_v13 = vpop.f32.mrb[1].mxu1 }
  0xf5   : > { %366 = vst.msk [vmem:[%s229_s19] sm:$0xff] %vm365_vm1, %v346_v12  ;;  %368 = vst.msk [vmem:[%s229_s19 + $0x10] sm:$0xff] %vm365_vm1, %v356_v13 }
  0xf6   : > { %600 = shalt.err (!%p597_p5)
}
  0xf7   : > { %s601_s6 = scalar_lea.hbm %s763_s28, 512  ;;  %s605_s9 = scalar_lea.hbm %s814_s3, 1024 }
  0xf8   : > { %p602_p6 = scmp.ne.s32.totalorder %s763_s28, %s601_s6  ;;  %p606_p10 = scmp.lt.u32.totalorder %s763_s28, %s814_s3 }
  0xf9   : > { %p607_p11 = scmp.lt.u32.totalorder %s605_s9, %s601_s6  ;;  %p609_p13 = scmp.lt.u32.totalorder %s601_s6, %s763_s28 }
  0xfa   : > { %p603_p7 = pnand %p602_p6, %p730_p4 }
  0xfb   : > { %p608_p12 = por %p607_p11, %p606_p10 }
  0xfc   : > { %p604_p9 = pneg %p603_p7 }
  0xfd   : > { %p610_p0 = por %p609_p13, %p608_p12 }
  0xff   : > { %p611_p1 = pnand %p610_p0, %p604_p9 }
 0x101   : > { %614 = shalt.err (!%p611_p1)
}
 0x102   : > { %s668_s18 = smov 128   ;;  %s669_s19 = smov 8  }
 0x103   : > { %530 = dma.vmem_to_hbm [thread:$0]  (%p730_p4), %s758_s21, 512, %s763_s28, %s765_s15, %s668_s18, %s668_s18, %s669_s19  }
 0x104 PF: > { %p536_p2 = scmp.ge.s32.totalorder %s665_s17, 2  ;;  %s402_s23 = sand.u32 1, %s645_s12  }
 0x105   : > { %s403_s26 = scalar_lea.sflag [#allocation3], %s402_s23 }
 0x106   : > { %p533_p3 = pnand %p536_p2, %p737_p8 }
 0x108   : > { %640 = dma.done.wait (!%p533_p3), %s403_s26, 512  }
 0x109   : > { %642 = vsyncadd (!%p533_p3), %s403_s26, 4294966784  ;;  %s16_s17 = sadd.s32 1, %s665_s17   ;;  %s817_s12 = smov %s649_s13 }
 0x10a   : > { %p13_p5 = scmp.ge.s32.totalorder %s16_s17, 4   ;;  %s818_s13 = smov %s653_s14 }
 0x10b   : > { %s819_s14 = smov %s743_s25  ;;  %s820_s15 = smov %s661_s16 }
 0x10c   : > { %s821_s16 = smov %s823_s20  ;;  %15 = sbr.rel (!%p13_p5) target bundleno = 4 (0x4), region = 73 }
 0x113   :  { %408 = vsyncpa [#allocation3], 1 }
 0x114   :  { %410 = vsyncpa [#allocation3 + $0x1], 1 }

</bundles_post_ra>
